<compile_context>
chip_gen: v6e
topology: v6e:2x2x1
jax: 0.10.0
libtpu: 0.0.40
codegen_flags: <defaults>
</compile_context>

<pallas_src>
import math
import functools

import jax
import jax.numpy as jnp
import numpy as np
from jax import lax
from jax.experimental import pallas as pl
from jax.experimental.pallas import tpu as pltpu

MAX_LEN = 512                              # same default as the PyTorch module
_TARGET_BLOCK_BYTES = 4 * 1024 * 1024      # per output block (x2 double-buffered)


def _round_up(x: int, m: int) -> int:
    return ((x + m - 1) // m) * m


def _cdiv(a: int, b: int) -> int:
    return -(-a // b)


def _choose_tile_rows(row_bytes: int, total_rows: int) -> int:
    """Rows per grid step: multiple of 8, ~4 MiB per block, and at least two
    grid steps whenever the table has more than one 8-row tile (v7x megacore)."""
    t = max(8, (_TARGET_BLOCK_BYTES // row_bytes) // 8 * 8)
    half = _round_up(_cdiv(total_rows, 2), 8)     # cap so grid >= 2 when possible
    t = min(t, half)
    t = min(t, _round_up(total_rows, 8))
    return max(t, 8)


def _lane_constants(d_model: int, W: int, P: int):
    """Host-precomputed per-lane constants (f32, shape (1, W)):
         scale[l] = P * freq(dim_l)
         shift[l] = pos_in_row_l * freq(dim_l) + (pi/2 if dim_l odd else 0)
    so that the kernel computes pe = sin(row * scale + shift)."""
    lane = np.arange(W, dtype=np.int64)
    if P > 1:                                   # packed: W = lcm(d_model, 128)
        dim = lane % d_model
        pos_in_row = lane // d_model
        valid = np.ones(W, dtype=bool)
    else:                                       # wide: W = round_up(d_model, 128)
        valid = lane < d_model
        dim = np.minimum(lane, d_model - 1)
        pos_in_row = np.zeros(W, dtype=np.int64)

    # freq computed in f32 exactly like the torch module (matches div_term).
    half_idx = np.arange(0, d_model, 2, dtype=np.float32)
    freq_half = np.exp(half_idx * np.float32(-math.log(10000.0) / d_model))
    freq = freq_half.astype(np.float64)[dim // 2]                  # per lane
    phase = (dim % 2).astype(np.float64) * (math.pi / 2.0)

    scale64 = float(P) * freq
    shift64 = pos_in_row.astype(np.float64) * freq + phase
    scale = np.where(valid, scale64, 0.0).astype(np.float32)[None, :]
    shift = np.where(valid, shift64, 0.0).astype(np.float32)[None, :]
    return scale, shift


def _pe_kernel(scale_ref, shift_ref, o_ref, *, tile_rows: int):
    """o_ref: (tile_rows, W) block.  scale/shift: resident (1, W) constants.
    pe = sin(row * scale + shift) -- one mul, one add, one sin per element."""
    row0 = pl.program_id(0) * tile_rows
    row = (row0 + lax.broadcasted_iota(jnp.int32, (tile_rows, 1), 0)
           ).astype(jnp.float32)                                   # (tr, 1)
    o_ref[...] = jnp.sin(row * scale_ref[...] + shift_ref[...])


@functools.lru_cache(maxsize=None)
def _pe_table(d_model: int, max_len: int = MAX_LEN) -> jax.Array:
    """Builds the full pe table of shape (1, max_len, d_model), float32.

    Cached per (d_model, max_len): built once, every forward() just slices it.
    """
    assert d_model % 2 == 0, "PositionalEncoding requires even d_model"

    if d_model >= 128:
        W = _round_up(d_model, 128)      # lane-dense (padded) wide layout
        P = 1
    else:
        W = math.lcm(d_model, 128)       # lane-dense packed layout
        P = W // d_model                 # positions packed per output row

    rows = _cdiv(max_len, P)
    tile_rows = _choose_tile_rows(W * 4, rows)
    rows_pad = _round_up(rows, tile_rows)

    scale, shift = _lane_constants(d_model, W, P)

    out = pl.pallas_call(
        functools.partial(_pe_kernel, tile_rows=tile_rows),
        out_shape=jax.ShapeDtypeStruct((rows_pad, W), jnp.float32),
        grid=(rows_pad // tile_rows,),
        in_specs=[pl.BlockSpec((1, W), lambda i: (0, 0)),   # stays resident
                  pl.BlockSpec((1, W), lambda i: (0, 0))],  # stays resident
        out_specs=pl.BlockSpec((tile_rows, W), lambda i: (i, 0)),
        compiler_params=pltpu.CompilerParams(
            dimension_semantics=("parallel",)),
    )(jnp.asarray(scale), jnp.asarray(shift))

    if P > 1:
        # Row-major reshape is a pure view: flat index r*W + l == pos*d_model + dim.
        pe2d = out.reshape(rows_pad * P, d_model)[:max_len]
    else:
        pe2d = out[:max_len, :d_model]   # drop lane padding (if any)

    return pe2d[None, :, :]


def positional_encoding_forward(x: jax.Array, max_len: int = MAX_LEN) -> jax.Array:
    """Equivalent of PositionalEncoding.forward(x): returns pe[:, :x.shape[1]]."""
    _, seq_len, d_model = x.shape
    assert seq_len <= max_len, "seq_len exceeds max_len of the PE table"
    pe = _pe_table(int(d_model), int(max_len))
    return pe[:, :seq_len]


def _reference_pe(seq_len: int, d_model: int, max_len: int = MAX_LEN) -> np.ndarray:
    """Numpy float32 port of the PyTorch module's buffer construction."""
    position = np.arange(max_len, dtype=np.float32)[:, None]
    div_term = np.exp(np.arange(0, d_model, 2, dtype=np.float32)
                      * np.float32(-math.log(10000.0) / d_model))
    pe = np.zeros((1, max_len, d_model), dtype=np.float32)
    pe[0, :, 0::2] = np.sin(position * div_term)
    pe[0, :, 1::2] = np.cos(position * div_term)
    return pe[:, :seq_len]


if __name__ == "__main__":
    key = jax.random.PRNGKey(0)

    # Small shape from the module's forward signature (batch, seq_len, d_model).
    batch, seq_len, d_model = 2, 8, 32
    x = jax.random.normal(key, (batch, seq_len, d_model), dtype=jnp.float32)

    out = jax.block_until_ready(positional_encoding_forward(x))
    assert out.shape == (1, seq_len, d_model), out.shape
    np.testing.assert_allclose(np.asarray(out), _reference_pe(seq_len, d_model),
                               rtol=0, atol=1e-5)

    # Full-length (seq=512) validation across all layout paths:
    #   d=32  -> packed, 128 % d == 0            (W = 128, 4 positions/row)
    #   d=96  -> packed via lcm                  (W = 384, 4 positions/row)
    #   d=128 -> wide, multiple of 128           (W = 128)
    #   d=192 -> wide, padded to 256 lanes       (W = 256, sliced back)
    # atol=3e-4 covers the extra f32 argument roundings (phase fold / position
    # fold) at |arg| ~ 500; see header note.
    for d in (32, 96, 128, 192):
        xf = jnp.zeros((1, MAX_LEN, d), dtype=jnp.float32)
        of = jax.block_until_ready(positional_encoding_forward(xf))
        assert of.shape == (1, MAX_LEN, d), of.shape
        np.testing.assert_allclose(np.asarray(of), _reference_pe(MAX_LEN, d),
                                   rtol=0, atol=3e-4)

    print("KERNEL_OK")
</pallas_src>

<mosaic_0001>
module attributes {stable_mosaic.version = 11 : i64} {
  func.func @_pe_kernel(%arg0: i32, %arg1: memref<1x128xf32, #tpu.memory_space<vmem>>, %arg2: memref<1x128xf32, #tpu.memory_space<vmem>>, %arg3: memref<64x128xf32, #tpu.memory_space<vmem>>) attributes {dimension_semantics = [#tpu.dimension_semantics<parallel>], iteration_bounds = array<i64: 2>, scalar_prefetch = 0 : i64, scratch_operands = 0 : i64, tpu.core_type = #tpu.core_type<tc>, window_params = [{pipeline_mode = #tpu.pipeline_mode<synchronous>, transform_indices = @transform_0, window_bounds = array<i64: 1, 128>}, {pipeline_mode = #tpu.pipeline_mode<synchronous>, transform_indices = @transform_1, window_bounds = array<i64: 1, 128>}, {transform_indices = @transform_2, window_bounds = array<i64: 64, 128>}]} {
    %c64_i32 = arith.constant 64 : i32
    %0 = arith.muli %arg0, %c64_i32 : i32
    %1 = tpu.iota {dimensions = array<i32: 0>} : vector<64x1xi32>
    %2 = vector.broadcast %0 : i32 to vector<64x1xi32>
    %3 = arith.addi %2, %1 : vector<64x1xi32>
    %4 = arith.sitofp %3 : vector<64x1xi32> to vector<64x1xf32>
    %c0 = arith.constant 0 : index
    %c0_0 = arith.constant 0 : index
    %5 = vector.load %arg1[%c0, %c0_0] : memref<1x128xf32, #tpu.memory_space<vmem>>, vector<1x128xf32>
    %6 = vector.broadcast %4 : vector<64x1xf32> to vector<64x128xf32>
    %7 = vector.broadcast %5 : vector<1x128xf32> to vector<64x128xf32>
    %8 = arith.mulf %6, %7 : vector<64x128xf32>
    %c0_1 = arith.constant 0 : index
    %c0_2 = arith.constant 0 : index
    %9 = vector.load %arg2[%c0_1, %c0_2] : memref<1x128xf32, #tpu.memory_space<vmem>>, vector<1x128xf32>
    %10 = vector.broadcast %9 : vector<1x128xf32> to vector<64x128xf32>
    %11 = arith.addf %8, %10 : vector<64x128xf32>
    %12 = math.sin %11 : vector<64x128xf32>
    %c0_3 = arith.constant 0 : index
    %c0_4 = arith.constant 0 : index
    %13 = vector.load %arg3[%c0_3, %c0_4] : memref<64x128xf32, #tpu.memory_space<vmem>>, vector<64x128xf32>
    tpu.vector_store %arg3[%c0_3, %c0_4], %12 {strides = array<i32>} : memref<64x128xf32, #tpu.memory_space<vmem>>, vector<64x128xf32>,
    return
  }
  func.func @transform_0(%arg0: i32) -> (i32, i32) {
    %c0_i32 = arith.constant 0 : i32
    %c0_i32_0 = arith.constant 0 : i32
    %c0_i32_1 = arith.constant 0 : i32
    return %c0_i32, %c0_i32_0 : i32, i32
  }
  func.func @transform_1(%arg0: i32) -> (i32, i32) {
    %c0_i32 = arith.constant 0 : i32
    %c0_i32_0 = arith.constant 0 : i32
    %c0_i32_1 = arith.constant 0 : i32
    return %c0_i32, %c0_i32_0 : i32, i32
  }
  func.func @transform_2(%arg0: i32) -> (i32, i32) {
    %c0_i32 = arith.constant 0 : i32
    %c0_i32_0 = arith.constant 0 : i32
    return %arg0, %c0_i32 : i32, i32
  }
}

</mosaic_0001>

<bundles_post_ra>
// kernel: tpu_custom_call.1
= control target key start
LH: loop header
LB: loop body
LE: loop exit
PB: predicated region body
PF: predicated region fallthrough
CT: control target
= control target key end

     0   :  { %7 = vsyncpa [#allocation3], 0  ;;  %s2106_s0 = inlined_call_operand.hbm [shape: f32[1,128], index: 0, kind: input, shape index: {}]   ;;  %s2107_s1 = inlined_call_operand.vmem [shape: f32[1,128], index: 1, kind: input, shape index: {}]   ;;  %s2108_s2 = inlined_call_operand.hbm [shape: f32[128,128], index: 2, kind: output, shape index: {}]  }
   0x1   :  { %8 = vsyncpa [#allocation4], 0 }
   0x2   :  { %10 = vsyncpa [#allocation4 + $0x1], 0  ;;  %s1395_s9 = smov 0   ;;  %s1397_s10 = smov 0  }
   0x3   :  { %s1399_s11 = smov 0   ;;  %s1401_s12 = smov 0  }
   0x4 LB: > { %s1416_s13 = sadd.s32 4294967295, %s1368_s12   ;;  %s1109_s14 = sadd.s32 4294967294, %s1368_s12   ;;  %s1368_s12 = sphi %s1401_s12, %s2127_s12   ;;  %s1364_s11 = sphi %s1399_s11, %s2126_s11   ;;  %s1360_s10 = sphi %s1397_s10, %s2125_s10   ;;  %s1356_s9 = sphi %s1395_s9, %s2124_s9  }
   0x5   : > { %s1420_s15 = sadd.s32 1, %s1368_s12   ;;  %s65_s16 = sadd.s32 1, %s1364_s11 }
   0x6   : > { %s62_s17 = ssub.s32 %s1368_s12, %s1420_s15  ;;  %p75_p0 = scmp.ne.s32.totalorder %s1364_s11, %s1360_s10 }
   0x7   : > { %p63_p1 = scmp.eq.s32.totalorder %s62_s17, 0  ;;  %p76_p2 = scmp.eq.s32.totalorder %s1416_s13, 1 }
   0x8   : > { %p81_p3 = scmp.ne.s32.totalorder %s1360_s10, %s1356_s9  ;;  %p82_p4 = scmp.eq.s32.totalorder %s1109_s14, 1 }
   0x9   : > { %s1431_s18 = scalar_select %p63_p1, %s1364_s11, %s65_s16  }
   0xa   : > { %p1433_p5 = por %p76_p2, %p75_p0  ;;  %p1437_p6 = por %p82_p4, %p81_p3 }
   0xb   : > { %p1110_p7 = scmp.ge.s32.totalorder %s1368_s12, 1  ;;  %p89_p8 = scmp.lt.s32.totalorder %s1368_s12, 3 }
   0xc   : > { %p1202_p9 = scmp.eq.s32.totalorder %s1416_s13, 0  ;;  %s1370_s22 = smov [#allocation2]  }
   0xd   : > { %p1444_p10 = pnand %p1110_p7, %p89_p8  ;;  %s102_s23 = sshll.u32 %s1370_s22, 4  ;;  %s103_s23 = int_to_ptr.vmem [resolvable:$true] %s102_s23 }
   0xe   : > { %s1289_s24 = scalar_lea.vmem %s103_s23, 16  ;;  %s1296_s25 = scalar_lea.vmem %s103_s23, 32 }
   0xf   : > { %p1194_p11 = pneg %p1444_p10  ;;  %p1290_p0 = scmp.ne.s32.totalorder %s103_s23, %s1289_s24 }
  0x10   : > { %p1297_p3 = scmp.lt.s32.totalorder %s103_s23, %s103_s23  ;;  %p1298_p4 = scmp.lt.s32.totalorder %s1296_s25, %s1289_s24 }
  0x11   : > { %p1195_p12 = pnand %p1202_p9, %p1194_p11 }
  0x12   : > { %p1299_p7 = por %p1298_p4, %p1297_p3 }
  0x13   : > { %p1280_p13 = pneg %p1195_p12 }
  0x15   : > { %p1292_p1 = pnand %p1290_p0, %p1280_p13 }
  0x17   : > { %p1293_p2 = pneg %p1292_p1 }
  0x19   : > { %p1300_p8 = pnand %p1299_p7, %p1293_p2 }
  0x1b   : > { %1303 = shalt.err (!%p1300_p8)
}
  0x1c   : > { %1197 = dma.hbm_to_vmem [thread:$0]  (!%p1195_p12), %s2106_s0, 16, %s103_s23, [#allocation3]  }
  0x1d   : > { %118 = sbr.rel (%p1444_p10) target bundleno = 299 (0x12b), region = 28 }
  0x22   : > { %1347 = dma.done.wait (%p1202_p9), [#allocation3], 16  }
  0x23   : > { %1349 = vsyncadd (%p1202_p9), [#allocation3], 4294967280  ;;  %s1115_s28 = sshll.u32 %s1416_s13, 6  ;;  %v137_v0 = vlaneseq  ;;  %v1116_v18 = vld [vmem:[#allocation2] ss:$0 sm:$0xff]  ;;  %s132_s3 = sand.u32 1, %s1360_s10  }
  0x24   : > { %v146_v2 = vstv %s1115_s28  ;;  %v1117_v22 = vld [vmem:[%s2107_s1] ss:$0 sm:$0xff]  ;;  %s1114_s4 = sshll.u32 %s132_s3, 6  ;;  %s1155_s6 = sshll.u32 %s1416_s13, 10 }
  0x25   : > { %v138_v1 = vshrl.u32 %v137_v0, 7  ;;  %s1778_s5 = scalar_lea.vmem [#allocation5], %s1114_s4  ;;  %s2059_s16 = scalar_lea.hbm %s2108_s2, %s1155_s6 }
  0x26   : > { %s1047_s7 = sshll.u32 %s1778_s5, 4  ;;  %s2066_s13 = scalar_lea.sflag [#allocation4], %s132_s3  ;;  %s2061_s7 = int_to_ptr.vmem [resolvable:$true] %s1047_s7 }
  0x27   : > { %v139_v3 = vadd.s32 8, %v138_v1  ;;  %v140_v4 = vadd.s32 16, %v138_v1  ;;  %v142_v5 = vadd.s32 32, %v138_v1  ;;  %v143_v6 = vadd.s32 40, %v138_v1  ;;  %s1304_s17 = scalar_lea.vmem %s2061_s7, 1024  ;;  %s1377_s21 = smov [#allocation5]  }
  0x28   : > { %v144_v7 = vadd.s32 48, %v138_v1  ;;  %v145_v8 = vadd.s32 56, %v138_v1  ;;  %v147_v9 = vadd.s32 %v146_v2, %v138_v1  ;;  %v141_v10 = vadd.s32 24, %v138_v1  ;;  %p1305_p9 = scmp.ne.s32.totalorder %s2061_s7, %s1304_s17  ;;  %s1308_s22 = sshll.u32 %s1377_s21, 4  ;;  %s1309_s22 = int_to_ptr.vmem [resolvable:$false] %s1308_s22 }
  0x29   : > { %v148_v11 = vadd.s32 %v146_v2, %v139_v3  ;;  %v149_v12 = vadd.s32 %v146_v2, %v140_v4  ;;  %v151_v13 = vadd.s32 %v146_v2, %v142_v5  ;;  %v152_v14 = vadd.s32 %v146_v2, %v143_v6  ;;  %s1310_s23 = scalar_lea.vmem %s1309_s22, 2048  ;;  %p1311_p12 = scmp.lt.s32.totalorder %s2061_s7, %s1309_s22 }
  0x2a   : > { %v153_v15 = vadd.s32 %v146_v2, %v144_v7  ;;  %v154_v16 = vadd.s32 %v146_v2, %v145_v8  ;;  %v155_v17 = vcvt.s32.f32 %v147_v9  ;;  %v150_v27 = vadd.s32 %v146_v2, %v141_v10  ;;  %p1306_p10 = pnand %p1305_p9, %p1433_p5  ;;  %p1312_p13 = scmp.lt.s32.totalorder %s1310_s23, %s1304_s17 }
  0x2b   : > { %v156_v19 = vcvt.s32.f32 %v148_v11  ;;  %v157_v20 = vcvt.s32.f32 %v149_v12  ;;  %v159_v21 = vcvt.s32.f32 %v151_v13  ;;  %v160_v23 = vcvt.s32.f32 %v152_v14 }
  0x2c   : > { %v161_v24 = vcvt.s32.f32 %v153_v15  ;;  %v162_v25 = vcvt.s32.f32 %v154_v16  ;;  %v170_v26 = vmul.f32 %v1116_v18, %v155_v17  ;;  %v158_v44 = vcvt.s32.f32 %v150_v27  ;;  %p1307_p11 = pneg %p1306_p10  ;;  %p1313_p0 = por %p1312_p13, %p1311_p12 }
  0x2d   : > { %v171_v28 = vmul.f32 %v1116_v18, %v156_v19  ;;  %v172_v29 = vmul.f32 %v1116_v18, %v157_v20  ;;  %v174_v30 = vmul.f32 %v1116_v18, %v159_v21  ;;  %v175_v31 = vmul.f32 %v1116_v18, %v160_v23 }
  0x2e   : > { %v176_v32 = vmul.f32 %v1116_v18, %v161_v24  ;;  %v177_v33 = vmul.f32 %v1116_v18, %v162_v25  ;;  %v1465_v34 = vadd.f32 %v1117_v22, %v170_v26  ;;  %v173_v52 = vmul.f32 %v1116_v18, %v158_v44  ;;  %p1314_p1 = pnand %p1313_p0, %p1307_p11 }
  0x2f   : > { %v1467_v35 = vadd.f32 %v1117_v22, %v171_v28  ;;  %v1469_v36 = vadd.f32 %v1117_v22, %v174_v30  ;;  %v1471_v37 = vadd.f32 %v1117_v22, %v175_v31  ;;  %v1478_v41 = vadd.f32 %v1117_v22, %v172_v29 }
  0x30   : > { %v1473_v38 = vadd.f32 %v1117_v22, %v176_v32  ;;  %v1475_v39 = vadd.f32 %v1117_v22, %v177_v33  ;;  %v193_v40 = vand.u32 2147483647, %v1465_v34  ;;  %v196_v42 = vand.u32 2139095040, %v1465_v34 }
  0x31   : > { %v297_v43 = vand.u32 2147483647, %v1467_v35  ;;  %v300_v45 = vand.u32 2139095040, %v1467_v35  ;;  %v404_v51 = vand.u32 2139095040, %v1478_v41  ;;  %v1488_v60 = vadd.f32 %v1117_v22, %v173_v52 }
  0x32   : > { %v197_v46 = vshrl.u32 %v196_v42, 23  ;;  %v200_v47 = vand.u32 8388607, %v193_v40  ;;  %v401_v1 = vand.u32 2147483647, %v1478_v41  ;;  %vm195_vm13 = vcmp.lt.s32.totalorder %v1465_v34, 0 }
  0x33   : > { %v301_v48 = vshrl.u32 %v300_v45, 23  ;;  %v304_v49 = vand.u32 8388607, %v297_v43  ;;  %v405_v55 = vshrl.u32 %v404_v51, 23  ;;  %v1371_v7 = vmov 683565275  }
  0x34   : > { %v1118_v50 = vadd.s32 4294967169, %v197_v46  ;;  %v201_v56 = vor.u32 8388608, %v200_v47  ;;  %v1372_v9 = vmov 2475754826   ;;  %v1373_v11 = vmov 2131351028  }
  0x35   : > { %v1122_v53 = vadd.s32 4294967169, %v301_v48  ;;  %v305_v57 = vor.u32 8388608, %v304_v49  ;;  %v1126_v59 = vadd.s32 4294967169, %v405_v55  ;;  %v1374_v13 = vmov 2102212464  }
  0x36   : > { %v203_v54 = vadd.s32 1, %v1118_v50  ;;  %v1491_v2 = vshll.u32 %v201_v56, 8  ;;  %v1375_v15 = vmov 920167782   ;;  %v1376_v23 = vmov 1326507024  }
  0x37   : > { %v307_v58 = vadd.s32 1, %v1122_v53  ;;  %v1493_v4 = vshll.u32 %v305_v57, 8  ;;  %v1495_v5 = vadd.s32 1, %v1126_v59  ;;  %vm1596_vm14 = vcmp.le.f32.partialorder %v193_v40, 0.7853982 }
  0x38   : > { %vm204_vm0 = vcmp.gt.s32.totalorder %v203_v54, 0 }
  0x39   : > { %v205_v61 = vsel %vm204_vm0, %v203_v54, 0  ;;  %vm308_vm1 = vcmp.gt.s32.totalorder %v307_v58, 0  ;;  %vm412_vm11 = vcmp.gt.s32.totalorder %v1495_v5, 0 }
  0x3a   : > { %v206_v62 = vshrl.u32 %v205_v61, 5  ;;  %v207_v63 = vand.u32 31, %v205_v61  ;;  %v309_v0 = vsel %vm308_vm1, %v307_v58, 0 }
  0x3b   : > { %v311_v3 = vand.u32 31, %v309_v0  ;;  %v1502_v17 = vshrl.u32 %v309_v0, 5 }
  0x3c   : > { %v208_v6 = vsub.s32 32, %v207_v63  ;;  %v210_v8 = vshll.u32 %v1371_v7, %v207_v63  ;;  %v213_v10 = vshll.u32 %v1372_v9, %v207_v63  ;;  %v216_v12 = vshll.u32 %v1373_v11, %v207_v63 }
  0x3d   : > { %v219_v14 = vshll.u32 %v1374_v13, %v207_v63  ;;  %v222_v16 = vshll.u32 %v1375_v15, %v207_v63  ;;  %vm225_vm2 = vcmp.lt.s32.totalorder %v206_v62, 1  ;;  %vm226_vm3 = vcmp.lt.s32.totalorder %v206_v62, 2 }
  0x3e   : > { %v209_v18 = vshrl.u32 %v1371_v7, %v208_v6  ;;  %v211_v19 = vshrl.u32 %v1372_v9, %v208_v6  ;;  %v214_v20 = vshrl.u32 %v1373_v11, %v208_v6  ;;  %v217_v21 = vshrl.u32 %v1374_v13, %v208_v6 }
  0x3f   : > { %v220_v22 = vshrl.u32 %v1375_v15, %v208_v6  ;;  %v223_v24 = vshrl.u32 %v1376_v23, %v208_v6  ;;  %vm228_vm4 = vcmp.lt.s32.totalorder %v206_v62, 4  ;;  %v312_v28 = vsub.s32 32, %v311_v3 }
  0x40   : > { %v212_v25 = vor.u32 %v211_v19, %v210_v8  ;;  %v215_v26 = vor.u32 %v214_v20, %v213_v10  ;;  %v218_v27 = vor.u32 %v217_v21, %v216_v12  ;;  %vm227_vm5 = vcmp.lt.s32.totalorder %v206_v62, 3 }
  0x41   : > { %v221_v29 = vor.u32 %v220_v22, %v219_v14  ;;  %v224_v30 = vor.u32 %v223_v24, %v222_v16  ;;  %v314_v31 = vshll.u32 %v1371_v7, %v311_v3  ;;  %v317_v48 = vshll.u32 %v1372_v9, %v311_v3 }
  0x42   : > { %v229_v32 = vsel %vm225_vm2, %v209_v18, %v212_v25  ;;  %v230_v33 = vsel %vm228_vm4, %v218_v27, 2102212464  ;;  %v233_v42 = vsel %vm225_vm2, %v212_v25, %v215_v26  ;;  %v237_v44 = vsel %vm225_vm2, %v215_v26, %v218_v27 }
  0x43   : > { %v231_v45 = vsel %vm227_vm5, %v215_v26, %v230_v33  ;;  %v234_v46 = vsel %vm228_vm4, %v221_v29, 920167782  ;;  %v238_v47 = vsel %vm228_vm4, %v224_v30, 1326507024  ;;  %v313_v51 = vshrl.u32 %v1371_v7, %v312_v28 }
  0x44   : > { %v235_v49 = vsel %vm227_vm5, %v218_v27, %v234_v46  ;;  %v239_v50 = vsel %vm227_vm5, %v221_v29, %v238_v47  ;;  %v315_v52 = vshrl.u32 %v1372_v9, %v312_v28  ;;  %v232_v53 = vsel %vm226_vm3, %v229_v32, %v231_v45 }
  0x45   : > { %v236_v54 = vsel %vm226_vm3, %v233_v42, %v235_v49  ;;  %v240_v55 = vsel %vm226_vm3, %v237_v44, %v239_v50  ;;  %v318_v56 = vshrl.u32 %v1373_v11, %v312_v28  ;;  %v320_v6 = vshll.u32 %v1373_v11, %v311_v3 }
  0x46   : > { %v1522_v57 = vmul.u32.u64.low %v1491_v2, %v240_v55  ;;  %v1523_v58 = vmul.u32.u64.high %v1491_v2, %v240_v55, %v1522_v57  ;;  %v1526_v59 = vmul.u32.u64.low %v1491_v2, %v236_v54  ;;  %v1527_v61 = vmul.u32.u64.high %v1491_v2, %v236_v54, %v1526_v59 }
  0x47   : > { %v316_v63 = vor.u32 %v315_v52, %v314_v31  ;;  %v319_v0 = vor.u32 %v318_v56, %v317_v48  ;;  %v321_v8 = vshrl.u32 %v1374_v13, %v312_v28  ;;  %v323_v62 = vshll.u32 %v1374_v13, %v311_v3 }
  0x48   : > { %v324_v10 = vshrl.u32 %v1375_v15, %v312_v28  ;;  %v326_v12 = vshll.u32 %v1375_v15, %v311_v3  ;;  %v327_v14 = vshrl.u32 %v1376_v23, %v312_v28  ;;  %v248_v16 = vmul.u32 %v1491_v2, %v232_v53 }
  0x49   : > { %v322_v18 = vor.u32 %v321_v8, %v320_v6  ;;  %vm329_vm6 = vcmp.lt.s32.totalorder %v1502_v17, 1  ;;  %vm330_vm7 = vcmp.lt.s32.totalorder %v1502_v17, 2  ;;  %vm250_vm8 = vc.u32 %v1523_v58, %v1526_v59 }
  0x4a   : > { %v251_v19 = vadd.s32 1, %v1527_v61  ;;  %v325_v20 = vor.u32 %v324_v10, %v323_v62  ;;  %vm331_vm9 = vcmp.lt.s32.totalorder %v1502_v17, 3  ;;  %v328_v21 = vor.u32 %v327_v14, %v326_v12 }
  0x4b   : > { %vm332_vm10 = vcmp.lt.s32.totalorder %v1502_v17, 4  ;;  %v333_v3 = vsel %vm329_vm6, %v313_v51, %v316_v63  ;;  %v337_v22 = vsel %vm329_vm6, %v316_v63, %v319_v0  ;;  %v341_v26 = vsel %vm329_vm6, %v319_v0, %v322_v18 }
  0x4c   : > { %v252_v2 = vsel %vm250_vm8, %v251_v19, %v1527_v61  ;;  %v334_v24 = vsel %vm332_vm10, %v322_v18, 2102212464  ;;  %v338_v25 = vsel %vm332_vm10, %v325_v20, 920167782  ;;  %v342_v30 = vsel %vm332_vm10, %v328_v21, 1326507024 }
  0x4d   : > { %v253_v27 = vadd.s32 %v252_v2, %v248_v16  ;;  %v335_v28 = vsel %vm331_vm9, %v319_v0, %v334_v24  ;;  %v339_v29 = vsel %vm331_vm9, %v322_v18, %v338_v25  ;;  %v343_v33 = vsel %vm331_vm9, %v325_v20, %v342_v30 }
  0x4e   : > { %v336_v31 = vsel %vm330_vm7, %v333_v3, %v335_v28  ;;  %v340_v32 = vsel %vm330_vm7, %v337_v22, %v339_v29  ;;  %v344_v44 = vsel %vm330_vm7, %v341_v26, %v343_v33  ;;  %v413_v49 = vsel %vm412_vm11, %v1495_v5, 0 }
  0x4f   : > { %v254_v42 = vadd.s32 536870912, %v253_v27  ;;  %v1553_v45 = vmul.u32.u64.low %v1493_v4, %v340_v32  ;;  %v1554_v46 = vmul.u32.u64.high %v1493_v4, %v340_v32, %v1553_v45  ;;  %v415_v51 = vand.u32 31, %v413_v49 }
  0x50   : > { %v1558_v47 = vmul.u32.u64.low %v1493_v4, %v344_v44  ;;  %v1559_v48 = vmul.u32.u64.high %v1493_v4, %v344_v44, %v1558_v47  ;;  %v352_v52 = vmul.u32 %v1493_v4, %v336_v31  ;;  %v408_v53 = vand.u32 8388607, %v401_v1 }
  0x51   : > { %v255_v50 = vshrl.u32 %v254_v42, 30  ;;  %v505_v17 = vand.u32 2147483647, %v1488_v60  ;;  %v508_v54 = vand.u32 2139095040, %v1488_v60  ;;  %v355_v56 = vadd.s32 1, %v1554_v46 }
  0x52   : > { %vm354_vm12 = vc.u32 %v1559_v48, %v1553_v45  ;;  %v416_v57 = vsub.s32 32, %v415_v51  ;;  %v409_v63 = vor.u32 8388608, %v408_v53  ;;  %v1579_v62 = vshrl.u32 %v413_v49, 5 }
  0x53   : > { %v256_v55 = vshll.u32 %v255_v50, 30  ;;  %v356_v4 = vsel %vm354_vm12, %v355_v56, %v1554_v46  ;;  %v509_v0 = vshrl.u32 %v508_v54, 23  ;;  %v1576_v6 = vand.u32 8388607, %v505_v17 }
  0x54   : > { %v357_v61 = vadd.s32 %v356_v4, %v352_v52  ;;  %v418_v10 = vshll.u32 %v1371_v7, %v415_v51  ;;  %v421_v12 = vshll.u32 %v1372_v9, %v415_v51  ;;  %v419_v16 = vshrl.u32 %v1372_v9, %v416_v57 }
  0x55   : > { %v1571_v5 = vsub.s32 %v253_v27, %v256_v55  ;;  %v422_v18 = vshrl.u32 %v1373_v11, %v416_v57  ;;  %v424_v19 = vshll.u32 %v1373_v11, %v415_v51  ;;  %v425_v21 = vshrl.u32 %v1374_v13, %v416_v57 }
  0x56   : > { %v358_v14 = vadd.s32 536870912, %v357_v61  ;;  %v427_v3 = vshll.u32 %v1374_v13, %v415_v51  ;;  %v428_v22 = vshrl.u32 %v1375_v15, %v416_v57  ;;  %v279_v2 = vsub.s32 4, %v255_v50 }
  0x57   : > { %v259_v8 = vsub.s32 0, %v1571_v5  ;;  %v430_v25 = vshll.u32 %v1375_v15, %v415_v51  ;;  %v431_v26 = vshrl.u32 %v1376_v23, %v416_v57  ;;  %v249_v28 = vadd.s32 %v1526_v59, %v1523_v58 }
  0x58   : > { %v1590_v24 = vshrl.u32 %v358_v14, 30  ;;  %v1602_v30 = vshll.u32 %v409_v63, 8  ;;  %v1130_v31 = vadd.s32 4294967169, %v509_v0  ;;  %v417_v33 = vshrl.u32 %v1371_v7, %v416_v57 }
  0x59   : > { %v1119_v20 = vmin.u32 %v259_v8, %v1571_v5  ;;  %v420_v42 = vor.u32 %v419_v16, %v418_v10  ;;  %v423_v44 = vor.u32 %v422_v18, %v421_v12  ;;  %v426_v47 = vor.u32 %v425_v21, %v424_v19 }
  0x5a   : > { %v360_v32 = vshll.u32 %v1590_v24, 30  ;;  %v429_v49 = vor.u32 %v428_v22, %v427_v3  ;;  %vm433_vm15 = vcmp.lt.s32.totalorder %v1579_v62, 1  ;;  %v280_v40 = vsel %vm195_vm13, %v279_v2, %v255_v50 }
  0x5b   : > { %v261_v29 = vclz %v1119_v20  ;;  %v432_v58 = vor.u32 %v431_v26, %v430_v25  ;;  %vm436_vm0 = vcmp.lt.s32.totalorder %v1579_v62, 4  ;;  %vm434_vm2 = vcmp.lt.s32.totalorder %v1579_v62, 2 }
  0x5c   : > { %v1609_v51 = vsub.s32 %v357_v61, %v360_v32  ;;  %vm435_vm3 = vcmp.lt.s32.totalorder %v1579_v62, 3  ;;  %v438_v59 = vsel %vm436_vm0, %v426_v47, 2102212464  ;;  %v437_v54 = vsel %vm433_vm15, %v417_v33, %v420_v42 }
  0x5d   : > { %v1120_v46 = vadd.s32 4294967294, %v261_v29  ;;  %v441_v50 = vsel %vm433_vm15, %v420_v42, %v423_v44  ;;  %v442_v4 = vsel %vm436_vm0, %v429_v49, 920167782  ;;  %v439_v63 = vsel %vm435_vm3, %v423_v44, %v438_v59 }
  0x5e   : > { %v363_v53 = vsub.s32 0, %v1609_v51  ;;  %v443_v0 = vsel %vm435_vm3, %v426_v47, %v442_v4  ;;  %v445_v8 = vsel %vm433_vm15, %v423_v44, %v426_v47  ;;  %v446_v14 = vsel %vm436_vm0, %v432_v58, 1326507024 }
  0x5f   : > { %vm1121_vm1 = vcmp.lt.s32.totalorder %v1120_v46, 0  ;;  %v282_v16 = vsel %vm1596_vm14, 0, %v280_v40  ;;  %v513_v19 = vor.u32 8388608, %v1576_v6  ;;  %v515_v20 = vadd.s32 1, %v1130_v31 }
  0x60   : > { %v264_v52 = vsel %vm1121_vm1, 0, %v1120_v46  ;;  %v1123_v61 = vmin.u32 %v363_v53, %v1609_v51  ;;  %v440_v22 = vsel %vm434_vm2, %v437_v54, %v439_v63  ;;  %v447_v2 = vsel %vm435_vm3, %v429_v49, %v446_v14 }
  0x61   : > { %v265_v55 = vsub.s32 32, %v264_v52  ;;  %v266_v56 = vshll.u32 %v1571_v5, %v264_v52  ;;  %v269_v57 = vsub.s32 4294967266, %v264_v52  ;;  %v444_v5 = vsel %vm434_vm2, %v441_v50, %v443_v0 }
  0x62   : > { %v365_v18 = vclz %v1123_v61  ;;  %v448_v26 = vsel %vm434_vm2, %v445_v8, %v447_v2  ;;  %v286_v42 = vadd.s32 3, %v282_v16  ;;  %v353_v44 = vadd.s32 %v1553_v45, %v1559_v48 }
  0x63   : > { %v267_v10 = vshrl.u32 %v249_v28, %v265_v55  ;;  %v270_v12 = vadd.s32 127, %v269_v57  ;;  %v1645_v28 = vmul.u32.u64.low %v1602_v30, %v444_v5  ;;  %v1646_v29 = vmul.u32.u64.high %v1602_v30, %v444_v5, %v1645_v28 }
  0x64   : > { %v1124_v25 = vadd.s32 4294967294, %v365_v18  ;;  %v1650_v31 = vmul.u32.u64.low %v1602_v30, %v448_v26  ;;  %v1651_v33 = vmul.u32.u64.high %v1602_v30, %v448_v26, %v1650_v31  ;;  %vm516_vm5 = vcmp.gt.s32.totalorder %v515_v20, 0 }
  0x65   : > { %v268_v21 = vor.u32 %v267_v10, %v266_v56  ;;  %v271_v3 = vshll.u32 %v270_v12, 23  ;;  %v456_v47 = vmul.u32 %v1602_v30, %v440_v22  ;;  %v517_v49 = vsel %vm516_vm5, %v515_v20, 0 }
  0x66   : > { %vm1125_vm4 = vcmp.lt.s32.totalorder %v1124_v25, 0  ;;  %v459_v52 = vadd.s32 1, %v1646_v29  ;;  %vm299_vm6 = vcmp.lt.s32.totalorder %v1467_v35, 0  ;;  %vm458_vm7 = vc.u32 %v1651_v33, %v1645_v28 }
  0x67   : > { %v272_v32 = vor.u32 4788187, %v271_v3  ;;  %v275_v6 = vcvt.s32.f32 %v268_v21  ;;  %v368_v62 = vsel %vm1125_vm4, 0, %v1124_v25  ;;  %v1661_v45 = vshll.u32 %v513_v19, 8 }
  0x68   : > { %v369_v40 = vsub.s32 32, %v368_v62  ;;  %v370_v58 = vshll.u32 %v1609_v51, %v368_v62  ;;  %v373_v59 = vsub.s32 4294967266, %v368_v62  ;;  %v460_v50 = vsel %vm458_vm7, %v459_v52, %v1646_v29 }
  0x69   : > { %v273_v46 = vand.u32 2147483647, %v272_v32  ;;  %v519_v30 = vand.u32 31, %v517_v49  ;;  %v1664_v56 = vand.u32 3, %v286_v42  ;;  %v383_v51 = vsub.s32 4, %v1590_v24 }
  0x6a   : > { %v371_v48 = vshrl.u32 %v353_v44, %v369_v40  ;;  %v374_v54 = vadd.s32 127, %v373_v59  ;;  %v461_v57 = vadd.s32 %v460_v50, %v456_v47  ;;  %vm1669_vm8 = vcmp.le.f32.partialorder %v297_v43, 0.7853982 }
  0x6b   : > { %v276_v53 = vmul.f32 %v275_v6, %v273_v46  ;;  %v1673_v0 = vshrl.u32 %v517_v49, 5  ;;  %v520_v8 = vsub.s32 32, %v519_v30  ;;  %v522_v5 = vshll.u32 %v1371_v7, %v519_v30 }
  0x6c   : > { %v372_v61 = vor.u32 %v371_v48, %v370_v58  ;;  %v375_v63 = vshll.u32 %v374_v54, 23  ;;  %v462_v12 = vadd.s32 536870912, %v461_v57  ;;  %v525_v14 = vshll.u32 %v1372_v9, %v519_v30 }
  0x6d   : > { %v277_v55 = vxor.u32 2147483648, %v276_v53  ;;  %v528_v19 = vshll.u32 %v1373_v11, %v519_v30  ;;  %v523_v21 = vshrl.u32 %v1372_v9, %v520_v8  ;;  %v526_v3 = vshrl.u32 %v1373_v11, %v520_v8 }
  0x6e   : > { %v376_v16 = vor.u32 4788187, %v375_v63  ;;  %v379_v18 = vcvt.s32.f32 %v372_v61  ;;  %v463_v20 = vshrl.u32 %v462_v12, 30  ;;  %v529_v2 = vshrl.u32 %v1374_v13, %v520_v8 }
  0x6f   : > { %v278_v10 = vsel %vm195_vm13, %v277_v55, %v276_v53  ;;  %v531_v25 = vshll.u32 %v1374_v13, %v519_v30  ;;  %v384_v27 = vsel %vm299_vm6, %v383_v51, %v1590_v24  ;;  %vm403_vm9 = vcmp.lt.s32.totalorder %v1478_v41, 0 }
  0x70   : > { %v281_v43 = vsel %vm1596_vm14, %v1465_v34, %v278_v10  ;;  %v377_v22 = vand.u32 2147483647, %v376_v16  ;;  %v464_v26 = vshll.u32 %v463_v20, 30  ;;  %vm537_vm10 = vcmp.lt.s32.totalorder %v1673_v0, 1 }
  0x71   : > { %1246 = vcosq.f32 %v281_v43  ;;  %v609_v29 = vand.u32 2147483647, %v1469_v36  ;;  %v521_v6 = vshrl.u32 %v1371_v7, %v520_v8  ;;  %v532_v31 = vshrl.u32 %v1375_v15, %v520_v8 }
  0x72   : > { %1248 = vsinq.f32 %v281_v43  ;;  %v380_v32 = vmul.f32 %v379_v18, %v377_v22  ;;  %v534_v42 = vshll.u32 %v1375_v15, %v519_v30  ;;  %v1696_v44 = vsub.s32 %v461_v57, %v464_v26 }
  0x73   : > { %v524_v46 = vor.u32 %v523_v21, %v522_v5  ;;  %v527_v62 = vor.u32 %v526_v3, %v525_v14  ;;  %v535_v24 = vshrl.u32 %v1376_v23, %v520_v8  ;;  %vm292_vm11 = vcmp.eq.s32.totalorder %v1664_v56, 2 }
  0x74   : > { %v381_v47 = vxor.u32 2147483648, %v380_v32  ;;  %v530_v49 = vor.u32 %v529_v2, %v528_v19  ;;  %v533_v40 = vor.u32 %v532_v31, %v531_v25  ;;  %vm540_vm12 = vcmp.lt.s32.totalorder %v1673_v0, 4 }
  0x75   : > { %vm289_vm13 = vcmp.eq.s32.totalorder %v1664_v56, 0  ;;  %v386_v58 = vsel %vm1669_vm8, 0, %v384_v27  ;;  %vm1706_vm14 = vcmp.le.f32.partialorder %v401_v1, 0.7853982  ;;  %v467_v52 = vsub.s32 0, %v1696_v44 }
  0x76   : > { %v487_v53 = vsub.s32 4, %v463_v20  ;;  %vm539_vm15 = vcmp.lt.s32.totalorder %v1673_v0, 3  ;;  %vm288_vm0 = vcmp.lt.s32.totalorder %v1664_v56, 2  ;;  %v382_v48 = vsel %vm299_vm6, %v381_v47, %v380_v32 }
  0x77   : > { %v536_v54 = vor.u32 %v535_v24, %v534_v42  ;;  %v542_v50 = vsel %vm540_vm12, %v530_v49, 2102212464  ;;  %v546_v1 = vsel %vm540_vm12, %v533_v40, 920167782  ;;  %vm285_vm1 = vweird.f32 %v1465_v34 }
  0x78   : > { %v385_v30 = vsel %vm1669_vm8, %v1467_v35, %v382_v48  ;;  %v1127_v55 = vmin.u32 %v467_v52, %v1696_v44  ;;  %vm538_vm2 = vcmp.lt.s32.totalorder %v1673_v0, 2  ;;  %v545_v51 = vsel %vm537_vm10, %v524_v46, %v527_v62 }
  0x79   : > { %1250 = vcosq.f32 %v385_v30  ;;  %v541_v57 = vsel %vm537_vm10, %v521_v6, %v524_v46  ;;  %v547_v61 = vsel %vm539_vm15, %v530_v49, %v546_v1  ;;  %v612_v63 = vand.u32 2139095040, %v1469_v36 }
  0x7a   : > { %1252 = vsinq.f32 %v385_v30  ;;  %v469_v8 = vclz %v1127_v55  ;;  %v543_v4 = vsel %vm539_vm15, %v527_v62, %v542_v50  ;;  %v549_v10 = vsel %vm537_vm10, %v527_v62, %v530_v49 }
  0x7b   : > { %v390_v12 = vadd.s32 3, %v386_v58  ;;  %v488_v5 = vsel %vm403_vm9, %v487_v53, %v463_v20  ;;  %v548_v14 = vsel %vm538_vm2, %v545_v51, %v547_v61  ;;  %v550_v43 = vsel %vm540_vm12, %v536_v54, 1326507024 }
  0x7c   : > { %v1128_v16 = vadd.s32 4294967294, %v469_v8  ;;  %v551_v18 = vsel %vm539_vm15, %v533_v40, %v550_v43  ;;  %v1746_v19 = vmul.u32.u64.low %v1661_v45, %v548_v14  ;;  %v1747_v21 = vmul.u32.u64.high %v1661_v45, %v548_v14, %v1746_v19 }
  0x7d   : > { %v457_v22 = vadd.s32 %v1645_v28, %v1651_v33  ;;  %v544_v20 = vsel %vm538_vm2, %v541_v57, %v543_v4  ;;  %v552_v2 = vsel %vm538_vm2, %v549_v10, %v551_v18  ;;  %v613_v25 = vshrl.u32 %v612_v63, 23 }
  0x7e   : > { %v1247_v3 = vpop.eup %1246  ;;  %vm1129_vm3 = vcmp.lt.s32.totalorder %v1128_v16, 0  ;;  %v1759_v32 = vmul.u32.u64.low %v1661_v45, %v552_v2  ;;  %v1760_v6 = vmul.u32.u64.high %v1661_v45, %v552_v2, %v1759_v32  ;;  %v490_v28 = vsel %vm1706_vm14, 0, %v488_v5 }
  0x7f   : > { %v1249_v27 = vpop.eup %1248  ;;  %v293_v26 = vxor.u32 2147483648, %v1247_v3  ;;  %v472_v42 = vsel %vm1129_vm3, 0, %v1128_v16  ;;  %v1134_v33 = vadd.s32 4294967169, %v613_v25  ;;  %v560_v49 = vmul.u32 %v1661_v45, %v544_v20 }
  0x80   : > { %v290_v31 = vxor.u32 2147483648, %v1249_v27  ;;  %v473_v46 = vsub.s32 32, %v472_v42  ;;  %v474_v62 = vshll.u32 %v1696_v44, %v472_v42  ;;  %v477_v24 = vsub.s32 4294967266, %v472_v42 }
  0x81   : > { %v294_v0 = vsel %vm292_vm11, %v293_v26, %v1249_v27  ;;  %v563_v40 = vadd.s32 1, %v1747_v21  ;;  %v619_v58 = vadd.s32 1, %v1134_v33  ;;  %v391_v53 = vand.u32 3, %v390_v12 }
  0x82   : > { %v291_v47 = vsel %vm289_vm13, %v1247_v3, %v290_v31  ;;  %v475_v48 = vshrl.u32 %v457_v22, %v473_v46  ;;  %v478_v54 = vadd.s32 127, %v477_v24  ;;  %v494_v1 = vadd.s32 3, %v490_v28 }
  0x83   : > { %v295_v52 = vsel %vm288_vm0, %v291_v47, %v294_v0  ;;  %vm562_vm4 = vc.u32 %v1760_v6, %v1746_v19  ;;  %vm620_vm5 = vcmp.gt.s32.totalorder %v619_v58, 0  ;;  %vm389_vm6 = vweird.f32 %v1467_v35 }
  0x84   : > { %v296_v50 = vsel %vm285_vm1, nan, %v295_v52  ;;  %v476_v44 = vor.u32 %v475_v48, %v474_v62  ;;  %v479_v30 = vshll.u32 %v478_v54, 23  ;;  %v564_v45 = vsel %vm562_vm4, %v563_v40, %v1747_v21 }
  0x85   : > { %v621_v55 = vsel %vm620_vm5, %v619_v58, 0  ;;  %1025 = vst [vmem:[%s1778_s5] sm:$0xff] %v296_v50  ;;  %v565_v56 = vadd.s32 %v564_v45, %v560_v49  ;;  %vm392_vm7 = vcmp.lt.s32.totalorder %v391_v53, 2  ;;  %vm396_vm8 = vcmp.eq.s32.totalorder %v391_v53, 2 }
  0x86   : > { %v623_v51 = vand.u32 31, %v621_v55  ;;  %v1251_v34 = vpop.eup %1250  ;;  %v480_v57 = vor.u32 4788187, %v479_v30  ;;  %v483_v61 = vcvt.s32.f32 %v476_v44  ;;  %vm393_vm10 = vcmp.eq.s32.totalorder %v391_v53, 0 }
  0x87   : > { %v1253_v63 = vpop.eup %1252  ;;  %v397_v8 = vxor.u32 2147483648, %v1251_v34  ;;  %v566_v4 = vadd.s32 536870912, %v565_v56  ;;  %v1782_v14 = vand.u32 3, %v494_v1  ;;  %v616_v43 = vand.u32 8388607, %v609_v29 }
  0x88   : > { %v624_v10 = vsub.s32 32, %v623_v51  ;;  %v394_v12 = vxor.u32 2147483648, %v1253_v63  ;;  %v481_v5 = vand.u32 2147483647, %v480_v57  ;;  %v626_v21 = vshll.u32 %v1371_v7, %v623_v51 }
  0x89   : > { %v398_v16 = vsel %vm396_vm8, %v397_v8, %v1253_v63  ;;  %v1786_v18 = vshrl.u32 %v566_v4, 30  ;;  %v629_v3 = vshll.u32 %v1372_v9, %v623_v51  ;;  %v632_v25 = vshll.u32 %v1373_v11, %v623_v51 }
  0x8a   : > { %v395_v22 = vsel %vm393_vm10, %v1251_v34, %v394_v12  ;;  %v484_v20 = vmul.f32 %v483_v61, %v481_v5  ;;  %v627_v2 = vshrl.u32 %v1372_v9, %v624_v10  ;;  %v630_v32 = vshrl.u32 %v1373_v11, %v624_v10 }
  0x8b   : > { %v399_v27 = vsel %vm392_vm7, %v395_v22, %v398_v16  ;;  %v568_v26 = vshll.u32 %v1786_v18, 30  ;;  %v633_v31 = vshrl.u32 %v1374_v13, %v624_v10  ;;  %v617_v33 = vor.u32 8388608, %v616_v43 }
  0x8c   : > { %v400_v42 = vsel %vm389_vm6, nan, %v399_v27  ;;  %v485_v28 = vxor.u32 2147483648, %v484_v20  ;;  %v622_v0 = vshrl.u32 %v621_v55, 5  ;;  %v625_v62 = vshrl.u32 %v1371_v7, %v624_v10 }
  0x8d   : > { %v1798_v46 = vsub.s32 %v565_v56, %v568_v26  ;;  %v635_v24 = vshll.u32 %v1374_v13, %v623_v51  ;;  %v636_v47 = vshrl.u32 %v1375_v15, %v624_v10  ;;  %1026 = vst [vmem:[%s1778_s5 + $0x8] sm:$0xff] %v400_v42  ;;  %v628_v40 = vor.u32 %v627_v2, %v626_v21 }
  0x8e   : > { %v486_v49 = vsel %vm403_vm9, %v485_v28, %v484_v20  ;;  %v638_v58 = vshll.u32 %v1375_v15, %v623_v51  ;;  %v639_v35 = vshrl.u32 %v1376_v23, %v624_v10  ;;  %v631_v48 = vor.u32 %v630_v32, %v629_v3 }
  0x8f   : > { %v489_v52 = vsel %vm1706_vm14, %v1478_v41, %v486_v49  ;;  %v571_v53 = vsub.s32 0, %v1798_v46  ;;  %v634_v54 = vor.u32 %v633_v31, %v632_v25  ;;  %v637_v50 = vor.u32 %v636_v47, %v635_v24 }
  0x90   : > { %1254 = vcosq.f32 %v489_v52  ;;  %v640_v1 = vor.u32 %v639_v35, %v638_v58  ;;  %vm641_vm11 = vcmp.lt.s32.totalorder %v622_v0, 1  ;;  %v657_v30 = vshll.u32 %v617_v33, 8 }
  0x91   : > { %1256 = vsinq.f32 %v489_v52  ;;  %v1131_v44 = vmin.u32 %v571_v53, %v1798_v46  ;;  %v713_v45 = vand.u32 2147483647, %v1471_v37  ;;  %v561_v55 = vadd.s32 %v1746_v19, %v1760_v6 }
  0x92   : > { %vm643_vm9 = vcmp.lt.s32.totalorder %v622_v0, 3  ;;  %vm644_vm12 = vcmp.lt.s32.totalorder %v622_v0, 4  ;;  %v716_v59 = vand.u32 2139095040, %v1471_v37  ;;  %vm642_vm13 = vcmp.lt.s32.totalorder %v622_v0, 2 }
  0x93   : > { %v573_v56 = vclz %v1131_v44  ;;  %v649_v51 = vsel %vm641_vm11, %v628_v40, %v631_v48  ;;  %v653_v34 = vsel %vm641_vm11, %v631_v48, %v634_v54  ;;  %v645_v57 = vsel %vm641_vm11, %v625_v62, %v628_v40 }
  0x94   : > { %v646_v61 = vsel %vm644_vm12, %v634_v54, 2102212464  ;;  %v650_v63 = vsel %vm644_vm12, %v637_v50, 920167782  ;;  %v654_v8 = vsel %vm644_vm12, %v640_v1, 1326507024  ;;  %vm493_vm15 = vweird.f32 %v1478_v41 }
  0x95   : > { %v1132_v4 = vadd.s32 4294967294, %v573_v56  ;;  %v647_v10 = vsel %vm643_vm9, %v631_v48, %v646_v61  ;;  %v651_v12 = vsel %vm643_vm9, %v634_v54, %v650_v63  ;;  %v655_v5 = vsel %vm643_vm9, %v637_v50, %v654_v8 }
  0x96   : > { %v591_v43 = vsub.s32 4, %v1786_v18  ;;  %v652_v19 = vsel %vm642_vm13, %v649_v51, %v651_v12  ;;  %v656_v6 = vsel %vm642_vm13, %v653_v34, %v655_v5  ;;  %v717_v16 = vshrl.u32 %v716_v59, 23 }
  0x97   : > { %vm1133_vm14 = vcmp.lt.s32.totalorder %v1132_v4, 0  ;;  %v648_v21 = vsel %vm642_vm13, %v645_v57, %v647_v10  ;;  %v1821_v3 = vmul.u32.u64.low %v657_v30, %v656_v6  ;;  %v1822_v22 = vmul.u32.u64.high %v657_v30, %v656_v6, %v1821_v3 }
  0x98   : > { %v576_v20 = vsel %vm1133_vm14, 0, %v1132_v4  ;;  %v1825_v2 = vmul.u32.u64.low %v657_v30, %v652_v19  ;;  %v1826_v25 = vmul.u32.u64.high %v657_v30, %v652_v19, %v1825_v2  ;;  %v1138_v27 = vadd.s32 4294967169, %v717_v16 }
  0x99   : > { %vm507_vm0 = vcmp.lt.s32.totalorder %v1488_v60, 0  ;;  %v577_v26 = vsub.s32 32, %v576_v20  ;;  %v578_v32 = vshll.u32 %v1798_v46, %v576_v20  ;;  %v581_v31 = vsub.s32 4294967266, %v576_v20 }
  0x9a   : > { %vm496_vm1 = vcmp.lt.s32.totalorder %v1782_v14, 2  ;;  %vm1834_vm2 = vcmp.le.f32.partialorder %v505_v17, 0.7853982  ;;  %v1841_v28 = vsel %vm507_vm0, %v591_v43, %v1786_v18  ;;  %v723_v33 = vadd.s32 1, %v1138_v27 }
  0x9b   : > { %v579_v0 = vshrl.u32 %v561_v55, %v577_v26  ;;  %v582_v62 = vadd.s32 127, %v581_v31  ;;  %v664_v24 = vmul.u32 %v657_v30, %v648_v21  ;;  %vm666_vm3 = vc.u32 %v1822_v22, %v1825_v2 }
  0x9c   : > { %vm497_vm4 = vcmp.eq.s32.totalorder %v1782_v14, 0  ;;  %v667_v46 = vadd.s32 1, %v1826_v25  ;;  %v720_v17 = vand.u32 8388607, %v713_v45  ;;  %vm724_vm5 = vcmp.gt.s32.totalorder %v723_v33, 0 }
  0x9d   : > { %v1255_v47 = vpop.eup %1254  ;;  %vm500_vm6 = vcmp.eq.s32.totalorder %v1782_v14, 2  ;;  %v580_v18 = vor.u32 %v579_v0, %v578_v32  ;;  %v583_v49 = vshll.u32 %v582_v62, 23  ;;  %v725_v40 = vsel %vm724_vm5, %v723_v33, 0 }
  0x9e   : > { %v1257_v58 = vpop.eup %1256  ;;  %v501_v35 = vxor.u32 2147483648, %v1255_v47  ;;  %v594_v52 = vsel %vm1834_vm2, 0, %v1841_v28  ;;  %v668_v53 = vsel %vm666_vm3, %v667_v46, %v1826_v25  ;;  %v727_v48 = vand.u32 31, %v725_v40 }
  0x9f   : > { %v498_v54 = vxor.u32 2147483648, %v1257_v58  ;;  %v584_v50 = vor.u32 4788187, %v583_v49  ;;  %v587_v1 = vcvt.s32.f32 %v580_v18  ;;  %v669_v44 = vadd.s32 %v668_v53, %v664_v24 }
  0xa0   : > { %v502_v30 = vsel %vm500_vm6, %v501_v35, %v1257_v58  ;;  %v721_v55 = vor.u32 8388608, %v720_v17  ;;  %v728_v59 = vsub.s32 32, %v727_v48  ;;  %v820_v56 = vand.u32 2139095040, %v1473_v38 }
  0xa1   : > { %v499_v51 = vsel %vm497_vm4, %v1255_v47, %v498_v54  ;;  %v585_v34 = vand.u32 2147483647, %v584_v50  ;;  %v670_v57 = vadd.s32 536870912, %v669_v44  ;;  %v726_v61 = vshrl.u32 %v725_v40, 5 }
  0xa2   : > { %v503_v63 = vsel %vm496_vm1, %v499_v51, %v502_v30  ;;  %v730_v8 = vshll.u32 %v1371_v7, %v727_v48  ;;  %v731_v4 = vshrl.u32 %v1372_v9, %v728_v59  ;;  %v733_v10 = vshll.u32 %v1372_v9, %v727_v48 }
  0xa3   : > { %v504_v12 = vsel %vm493_vm15, nan, %v503_v63  ;;  %v588_v5 = vmul.f32 %v587_v1, %v585_v34  ;;  %v1864_v43 = vshrl.u32 %v670_v57, 30  ;;  %v734_v19 = vshrl.u32 %v1373_v11, %v728_v59 }
  0xa4   : > { %v736_v6 = vshll.u32 %v1373_v11, %v727_v48  ;;  %v737_v16 = vshrl.u32 %v1374_v13, %v728_v59  ;;  %v739_v14 = vshll.u32 %v1374_v13, %v727_v48  ;;  %v740_v21 = vshrl.u32 %v1375_v15, %v728_v59  ;;  %1027 = vst [vmem:[%s1778_s5 + $0x10] sm:$0xff] %v504_v12 }
  0xa5   : > { %v589_v3 = vxor.u32 2147483648, %v588_v5  ;;  %v672_v20 = vshll.u32 %v1864_v43, 30  ;;  %v1873_v25 = vshll.u32 %v721_v55, 8  ;;  %v821_v41 = vshrl.u32 %v820_v56, 23 }
  0xa6   : > { %v729_v27 = vshrl.u32 %v1371_v7, %v728_v59  ;;  %v732_v26 = vor.u32 %v731_v4, %v730_v8  ;;  %v742_v32 = vshll.u32 %v1375_v15, %v727_v48  ;;  %v743_v31 = vshrl.u32 %v1376_v23, %v728_v59 }
  0xa7   : > { %v590_v28 = vsel %vm507_vm0, %v589_v3, %v588_v5  ;;  %v1880_v33 = vsub.s32 %v669_v44, %v672_v20  ;;  %v735_v0 = vor.u32 %v734_v19, %v733_v10  ;;  %v741_v62 = vor.u32 %v740_v21, %v739_v14 }
  0xa8   : > { %v593_v24 = vsel %vm1834_vm2, %v1488_v60, %v590_v28  ;;  %v738_v46 = vor.u32 %v737_v16, %v736_v6  ;;  %v744_v17 = vor.u32 %v743_v31, %v742_v32  ;;  %vm745_vm7 = vcmp.lt.s32.totalorder %v726_v61, 1 }
  0xa9   : > { %1258 = vcosq.f32 %v593_v24  ;;  %v675_v47 = vsub.s32 0, %v1880_v33  ;;  %vm747_vm8 = vcmp.lt.s32.totalorder %v726_v61, 3  ;;  %vm748_vm10 = vcmp.lt.s32.totalorder %v726_v61, 4 }
  0xaa   : > { %1260 = vsinq.f32 %v593_v24  ;;  %vm746_vm11 = vcmp.lt.s32.totalorder %v726_v61, 2  ;;  %v749_v18 = vsel %vm745_vm7, %v729_v27, %v732_v26  ;;  %v750_v49 = vsel %vm748_vm10, %v738_v46, 2102212464 }
  0xab   : > { %v1135_v40 = vmin.u32 %v675_v47, %v1880_v33  ;;  %v751_v58 = vsel %vm747_vm8, %v735_v0, %v750_v49  ;;  %v753_v35 = vsel %vm745_vm7, %v732_v26, %v735_v0  ;;  %v754_v53 = vsel %vm748_vm10, %v741_v62, 920167782 }
  0xac   : > { %v755_v42 = vsel %vm747_vm8, %v738_v46, %v754_v53  ;;  %v757_v48 = vsel %vm745_vm7, %v735_v0, %v738_v46  ;;  %v758_v54 = vsel %vm748_vm10, %v744_v17, 1326507024  ;;  %v598_v50 = vadd.s32 3, %v594_v52 }
  0xad   : > { %v677_v1 = vclz %v1135_v40  ;;  %v752_v44 = vsel %vm746_vm11, %v749_v18, %v751_v58  ;;  %v756_v30 = vsel %vm746_vm11, %v753_v35, %v755_v42  ;;  %v759_v55 = vsel %vm747_vm8, %v741_v62, %v758_v54 }
  0xae   : > { %v1142_v59 = vadd.s32 4294967169, %v821_v41  ;;  %v760_v51 = vsel %vm746_vm11, %v757_v48, %v759_v55  ;;  %v1894_v34 = vmul.u32.u64.low %v1873_v25, %v756_v30  ;;  %v1895_v57 = vmul.u32.u64.high %v1873_v25, %v756_v30, %v1894_v34 }
  0xaf   : > { %v1136_v56 = vadd.s32 4294967294, %v677_v1  ;;  %v695_v63 = vsub.s32 4, %v1864_v43  ;;  %v1900_v52 = vmul.u32.u64.low %v1873_v25, %v760_v51  ;;  %v1901_v8 = vmul.u32.u64.high %v1873_v25, %v760_v51, %v1900_v52 }
  0xb0   : > { %v827_v4 = vadd.s32 1, %v1142_v59  ;;  %vm597_vm9 = vweird.f32 %v1488_v60  ;;  %vm611_vm12 = vcmp.lt.s32.totalorder %v1469_v36, 0  ;;  %v665_v61 = vadd.s32 %v1825_v2, %v1822_v22 }
  0xb1   : > { %vm1137_vm13 = vcmp.lt.s32.totalorder %v1136_v56, 0  ;;  %v817_v10 = vand.u32 2147483647, %v1473_v38  ;;  %v599_v12 = vand.u32 3, %v598_v50  ;;  %v768_v19 = vmul.u32 %v1873_v25, %v752_v44 }
  0xb2   : > { %v680_v5 = vsel %vm1137_vm13, 0, %v1136_v56  ;;  %vm828_vm14 = vcmp.gt.s32.totalorder %v827_v4, 0  ;;  %v771_v21 = vadd.s32 1, %v1895_v57  ;;  %vm1913_vm15 = vcmp.le.f32.partialorder %v609_v29, 0.7853982 }
  0xb3   : > { %v681_v6 = vsub.s32 32, %v680_v5  ;;  %v682_v16 = vshll.u32 %v1880_v33, %v680_v5  ;;  %v685_v14 = vsub.s32 4294967266, %v680_v5  ;;  %v1920_v22 = vsel %vm611_vm12, %v695_v63, %v1864_v43 }
  0xb4   : > { %vm770_vm0 = vc.u32 %v1901_v8, %v1894_v34  ;;  %v829_v2 = vsel %vm828_vm14, %v827_v4, 0  ;;  %v824_v27 = vand.u32 8388607, %v817_v10  ;;  %vm600_vm1 = vcmp.lt.s32.totalorder %v599_v12, 2 }
  0xb5   : > { %v683_v20 = vshrl.u32 %v665_v61, %v681_v6  ;;  %v686_v25 = vadd.s32 127, %v685_v14  ;;  %v772_v41 = vsel %vm770_vm0, %v771_v21, %v1895_v57  ;;  %vm604_vm2 = vcmp.eq.s32.totalorder %v599_v12, 2 }
  0xb6   : > { %v1259_v29 = vpop.eup %1258  ;;  %v773_v26 = vadd.s32 %v772_v41, %v768_v19  ;;  %v831_v32 = vand.u32 31, %v829_v2  ;;  %vm601_vm3 = vcmp.eq.s32.totalorder %v599_v12, 0  ;;  %v698_v62 = vsel %vm1913_vm15, 0, %v1920_v22 }
  0xb7   : > { %v1261_v31 = vpop.eup %1260  ;;  %v605_v43 = vxor.u32 2147483648, %v1259_v29  ;;  %v684_v28 = vor.u32 %v683_v20, %v682_v16  ;;  %v687_v33 = vshll.u32 %v686_v25, 23  ;;  %v825_v49 = vor.u32 8388608, %v824_v27 }
  0xb8   : > { %v602_v0 = vxor.u32 2147483648, %v1261_v31  ;;  %v774_v24 = vadd.s32 536870912, %v773_v26  ;;  %v832_v46 = vsub.s32 32, %v831_v32  ;;  %v834_v35 = vshll.u32 %v1371_v7, %v831_v32 }
  0xb9   : > { %v606_v17 = vsel %vm604_vm2, %v605_v43, %v1261_v31  ;;  %v688_v47 = vor.u32 4788187, %v687_v33  ;;  %v691_v18 = vcvt.s32.f32 %v684_v28  ;;  %v837_v53 = vshll.u32 %v1372_v9, %v831_v32 }
  0xba   : > { %v603_v40 = vsel %vm601_vm3, %v1259_v29, %v602_v0  ;;  %v1930_v58 = vshrl.u32 %v774_v24, 30  ;;  %v835_v54 = vshrl.u32 %v1372_v9, %v832_v46  ;;  %v838_v50 = vshrl.u32 %v1373_v11, %v832_v46 }
  0xbb   : > { %v607_v42 = vsel %vm600_vm1, %v603_v40, %v606_v17  ;;  %v689_v48 = vand.u32 2147483647, %v688_v47  ;;  %v830_v30 = vshrl.u32 %v829_v2, 5  ;;  %v924_v55 = vand.u32 2139095040, %v1475_v39 }
  0xbc   : > { %v608_v1 = vsel %vm597_vm9, nan, %v607_v42  ;;  %v776_v44 = vshll.u32 %v1930_v58, 30  ;;  %v840_v56 = vshll.u32 %v1373_v11, %v831_v32  ;;  %v841_v51 = vshrl.u32 %v1374_v13, %v832_v46 }
  0xbd   : > { %v692_v59 = vmul.f32 %v691_v18, %v689_v48  ;;  %v843_v57 = vshll.u32 %v1374_v13, %v831_v32  ;;  %1028 = vst [vmem:[%s1778_s5 + $0x18] sm:$0xff] %v608_v1  ;;  %v844_v52 = vshrl.u32 %v1375_v15, %v832_v46  ;;  %v846_v4 = vshll.u32 %v1375_v15, %v831_v32 }
  0xbe   : > { %v777_v63 = vsub.s32 %v773_v26, %v776_v44  ;;  %v1947_v60 = vshll.u32 %v825_v49, 8  ;;  %v836_v12 = vor.u32 %v835_v54, %v834_v35  ;;  %v839_v5 = vor.u32 %v838_v50, %v837_v53 }
  0xbf   : > { %v693_v61 = vxor.u32 2147483648, %v692_v59  ;;  %v847_v19 = vshrl.u32 %v1376_v23, %v832_v46  ;;  %v833_v16 = vshrl.u32 %v1371_v7, %v832_v46  ;;  %v845_v14 = vor.u32 %v844_v52, %v843_v57 }
  0xc0   : > { %v779_v6 = vsub.s32 0, %v777_v63  ;;  %vm849_vm4 = vcmp.lt.s32.totalorder %v830_v30, 1  ;;  %v842_v22 = vor.u32 %v841_v51, %v840_v56  ;;  %vm850_vm5 = vcmp.lt.s32.totalorder %v830_v30, 2 }
  0xc1   : > { %v694_v21 = vsel %vm611_vm12, %v693_v61, %v692_v59  ;;  %vm852_vm6 = vcmp.lt.s32.totalorder %v830_v30, 4  ;;  %v848_v25 = vor.u32 %v847_v19, %v846_v4  ;;  %vm851_vm7 = vcmp.lt.s32.totalorder %v830_v30, 3 }
  0xc2   : > { %v697_v2 = vsel %vm1913_vm15, %v1469_v36, %v694_v21  ;;  %v1139_v20 = vmin.u32 %v779_v6, %v777_v63  ;;  %v854_v41 = vsel %vm852_vm6, %v842_v22, 2102212464  ;;  %v857_v27 = vsel %vm849_vm4, %v836_v12, %v839_v5 }
  0xc3   : > { %1262 = vcosq.f32 %v697_v2  ;;  %v858_v29 = vsel %vm852_vm6, %v845_v14, 920167782  ;;  %v925_v32 = vshrl.u32 %v924_v55, 23  ;;  %v853_v31 = vsel %vm849_vm4, %v833_v16, %v836_v12 }
  0xc4   : > { %1264 = vsinq.f32 %v697_v2  ;;  %v781_v26 = vclz %v1139_v20  ;;  %v855_v43 = vsel %vm851_vm7, %v839_v5, %v854_v41  ;;  %v859_v3 = vsel %vm851_vm7, %v842_v22, %v858_v29 }
  0xc5   : > { %v861_v28 = vsel %vm849_vm4, %v839_v5, %v842_v22  ;;  %v702_v33 = vadd.s32 3, %v698_v62  ;;  %v860_v24 = vsel %vm850_vm5, %v857_v27, %v859_v3  ;;  %v862_v46 = vsel %vm852_vm6, %v848_v25, 1326507024 }
  0xc6   : > { %v1140_v0 = vadd.s32 4294967294, %v781_v26  ;;  %v769_v17 = vadd.s32 %v1894_v34, %v1901_v8  ;;  %v863_v47 = vsel %vm851_vm7, %v845_v14, %v862_v46  ;;  %v856_v40 = vsel %vm850_vm5, %v853_v31, %v855_v43 }
  0xc7   : > { %v1969_v18 = vmul.u32.u64.low %v1947_v60, %v860_v24  ;;  %v1970_v49 = vmul.u32.u64.high %v1947_v60, %v860_v24, %v1969_v18  ;;  %v864_v62 = vsel %vm850_vm5, %v861_v28, %v863_v47  ;;  %v1146_v35 = vadd.s32 4294967169, %v925_v32 }
  0xc8   : > { %vm1141_vm8 = vcmp.lt.s32.totalorder %v1140_v0, 0  ;;  %v1976_v42 = vmul.u32.u64.low %v1947_v60, %v864_v62  ;;  %v1977_v48 = vmul.u32.u64.high %v1947_v60, %v864_v62, %v1976_v42  ;;  %v799_v50 = vsub.s32 4, %v1930_v58 }
  0xc9   : > { %v784_v53 = vsel %vm1141_vm8, 0, %v1140_v0  ;;  %v872_v1 = vmul.u32 %v1947_v60, %v856_v40  ;;  %v875_v44 = vadd.s32 1, %v1970_v49  ;;  %v931_v55 = vadd.s32 1, %v1146_v35 }
  0xca   : > { %v785_v54 = vsub.s32 32, %v784_v53  ;;  %v786_v34 = vshll.u32 %v777_v63, %v784_v53  ;;  %v789_v8 = vsub.s32 4294967266, %v784_v53  ;;  %vm701_vm10 = vweird.f32 %v1469_v36 }
  0xcb   : > { %v703_v30 = vand.u32 3, %v702_v33  ;;  %vm715_vm11 = vcmp.lt.s32.totalorder %v1471_v37, 0  ;;  %vm874_vm9 = vc.u32 %v1977_v48, %v1969_v18  ;;  %v921_v51 = vand.u32 2147483647, %v1475_v39 }
  0xcc   : > { %v787_v59 = vshrl.u32 %v769_v17, %v785_v54  ;;  %v790_v56 = vadd.s32 127, %v789_v8  ;;  %vm932_vm12 = vcmp.gt.s32.totalorder %v931_v55, 0  ;;  %v876_v52 = vsel %vm874_vm9, %v875_v44, %v1970_v49 }
  0xcd   : > { %v933_v4 = vsel %vm932_vm12, %v931_v55, 0  ;;  %vm1990_vm13 = vcmp.le.f32.partialorder %v713_v45, 0.7853982  ;;  %v800_v61 = vsel %vm715_vm11, %v799_v50, %v1930_v58  ;;  %v877_v12 = vadd.s32 %v876_v52, %v872_v1 }
  0xce   : > { %v788_v57 = vor.u32 %v787_v59, %v786_v34  ;;  %v791_v63 = vshll.u32 %v790_v56, 23  ;;  %v935_v5 = vand.u32 31, %v933_v4  ;;  %vm704_vm14 = vcmp.lt.s32.totalorder %v703_v30, 2 }
  0xcf   : > { %vm708_vm15 = vcmp.eq.s32.totalorder %v703_v30, 2  ;;  %vm705_vm0 = vcmp.eq.s32.totalorder %v703_v30, 0  ;;  %v878_v22 = vadd.s32 536870912, %v877_v12  ;;  %v802_v25 = vsel %vm1990_vm13, 0, %v800_v61 }
  0xd0   : > { %v1263_v19 = vpop.eup %1262  ;;  %v792_v6 = vor.u32 4788187, %v791_v63  ;;  %v795_v16 = vcvt.s32.f32 %v788_v57  ;;  %v936_v2 = vsub.s32 32, %v935_v5  ;;  %v928_v58 = vand.u32 8388607, %v921_v51 }
  0xd1   : > { %v1265_v14 = vpop.eup %1264  ;;  %v709_v21 = vxor.u32 2147483648, %v1263_v19  ;;  %v2001_v27 = vshrl.u32 %v878_v22, 30  ;;  %v938_v29 = vshll.u32 %v1371_v7, %v935_v5  ;;  %v941_v26 = vshll.u32 %v1372_v9, %v935_v5 }
  0xd2   : > { %v706_v45 = vxor.u32 2147483648, %v1265_v14  ;;  %v793_v20 = vand.u32 2147483647, %v792_v6  ;;  %v939_v43 = vshrl.u32 %v1372_v9, %v936_v2  ;;  %v944_v3 = vshll.u32 %v1373_v11, %v935_v5 }
  0xd3   : > { %v710_v41 = vsel %vm708_vm15, %v709_v21, %v1265_v14  ;;  %v880_v33 = vshll.u32 %v2001_v27, 30  ;;  %v942_v0 = vshrl.u32 %v1373_v11, %v936_v2  ;;  %v945_v24 = vshrl.u32 %v1374_v13, %v936_v2 }
  0xd4   : > { %v707_v32 = vsel %vm705_vm0, %v1263_v19, %v706_v45  ;;  %v796_v31 = vmul.f32 %v795_v16, %v793_v20  ;;  %v929_v47 = vor.u32 8388608, %v928_v58  ;;  %v934_v49 = vshrl.u32 %v933_v4, 5 }
  0xd5   : > { %v711_v28 = vsel %vm704_vm14, %v707_v32, %v710_v41  ;;  %v881_v40 = vsub.s32 %v877_v12, %v880_v33  ;;  %v937_v62 = vshrl.u32 %v1371_v7, %v936_v2  ;;  %v947_v9 = vshll.u32 %v1374_v13, %v935_v5 }
  0xd6   : > { %v712_v46 = vsel %vm701_vm10, nan, %v711_v28  ;;  %v797_v17 = vxor.u32 2147483648, %v796_v31  ;;  %v948_v35 = vshrl.u32 %v1375_v15, %v936_v2  ;;  %v940_v11 = vor.u32 %v939_v43, %v938_v29 }
  0xd7   : > { %1029 = vst [vmem:[%s1778_s5 + $0x20] sm:$0xff] %v712_v46  ;;  %v950_v42 = vshll.u32 %v1375_v15, %v935_v5  ;;  %v951_v36 = vshrl.u32 %v1376_v23, %v936_v2  ;;  %v883_v34 = vsub.s32 0, %v881_v40  ;;  %v943_v8 = vor.u32 %v942_v0, %v941_v26 }
  0xd8   : > { %v798_v53 = vsel %vm715_vm11, %v797_v17, %v796_v31  ;;  %v946_v7 = vor.u32 %v945_v24, %v944_v3  ;;  %v949_v13 = vor.u32 %v948_v35, %v947_v9  ;;  %vm953_vm1 = vcmp.lt.s32.totalorder %v934_v49, 1 }
  0xd9   : > { %v801_v54 = vsel %vm1990_vm13, %v1471_v37, %v798_v53  ;;  %v952_v50 = vor.u32 %v951_v36, %v950_v42  ;;  %v1143_v1 = vmin.u32 %v883_v34, %v881_v40  ;;  %v806_v44 = vadd.s32 3, %v802_v25 }
  0xda   : > { %1266 = vcosq.f32 %v801_v54  ;;  %vm955_vm2 = vcmp.lt.s32.totalorder %v934_v49, 3  ;;  %vm956_vm3 = vcmp.lt.s32.totalorder %v934_v49, 4  ;;  %v969_v55 = vshll.u32 %v929_v47, 8 }
  0xdb   : > { %1268 = vsinq.f32 %v801_v54  ;;  %v885_v15 = vclz %v1143_v1  ;;  %vm954_vm4 = vcmp.lt.s32.totalorder %v934_v49, 2  ;;  %v961_v23 = vsel %vm953_vm1, %v940_v11, %v943_v8 }
  0xdc   : > { %v965_v30 = vsel %vm953_vm1, %v943_v8, %v946_v7  ;;  %v957_v59 = vsel %vm953_vm1, %v937_v62, %v940_v11  ;;  %v958_v56 = vsel %vm956_vm3, %v946_v7, 2102212464  ;;  %v962_v57 = vsel %vm956_vm3, %v949_v13, 920167782 }
  0xdd   : > { %v966_v63 = vsel %vm956_vm3, %v952_v50, 1326507024  ;;  %v1144_v52 = vadd.s32 4294967294, %v885_v15  ;;  %v959_v4 = vsel %vm955_vm2, %v943_v8, %v958_v56  ;;  %v963_v60 = vsel %vm955_vm2, %v946_v7, %v962_v57 }
  0xde   : > { %v967_v61 = vsel %vm955_vm2, %v949_v13, %v966_v63  ;;  %v964_v12 = vsel %vm954_vm4, %v961_v23, %v963_v60  ;;  %v873_v19 = vadd.s32 %v1969_v18, %v1977_v48  ;;  %v960_v21 = vsel %vm954_vm4, %v957_v59, %v959_v4 }
  0xdf   : > { %v968_v5 = vsel %vm954_vm4, %v965_v30, %v967_v61  ;;  %vm1145_vm5 = vcmp.lt.s32.totalorder %v1144_v52, 0  ;;  %v2032_v22 = vmul.u32.u64.low %v969_v55, %v964_v12  ;;  %v2033_v2 = vmul.u32.u64.high %v969_v55, %v964_v12, %v2032_v22 }
  0xe0   : > { %v2028_v6 = vmul.u32.u64.low %v969_v55, %v968_v5  ;;  %v2029_v16 = vmul.u32.u64.high %v969_v55, %v968_v5, %v2028_v6  ;;  %v888_v14 = vsel %vm1145_vm5, 0, %v1144_v52  ;;  %v807_v45 = vand.u32 3, %v806_v44 }
  0xe1   : > { %v889_v20 = vsub.s32 32, %v888_v14  ;;  %v890_v25 = vshll.u32 %v881_v40, %v888_v14  ;;  %v893_v58 = vsub.s32 4294967266, %v888_v14  ;;  %v976_v26 = vmul.u32 %v969_v55, %v960_v21 }
  0xe2   : > { %vm978_vm6 = vc.u32 %v2029_v16, %v2032_v22  ;;  %v979_v18 = vadd.s32 1, %v2033_v2  ;;  %vm812_vm7 = vcmp.eq.s32.totalorder %v807_v45, 2  ;;  %vm808_vm8 = vcmp.lt.s32.totalorder %v807_v45, 2 }
  0xe3   : > { %v891_v41 = vshrl.u32 %v873_v19, %v889_v20  ;;  %v894_v29 = vadd.s32 127, %v893_v58  ;;  %vm809_vm10 = vcmp.eq.s32.totalorder %v807_v45, 0  ;;  %vm805_vm11 = vweird.f32 %v1471_v37 }
  0xe4   : > { %v980_v28 = vsel %vm978_vm6, %v979_v18, %v2033_v2  ;;  %vm819_vm9 = vcmp.lt.s32.totalorder %v1473_v38, 0  ;;  %v903_v11 = vsub.s32 4, %v2001_v27  ;;  %vm818_vm12 = vcmp.le.f32.partialorder %v817_v10, 0.7853982 }
  0xe5   : > { %v892_v32 = vor.u32 %v891_v41, %v890_v25  ;;  %v895_v31 = vshll.u32 %v894_v29, 23  ;;  %v981_v46 = vadd.s32 %v980_v28, %v976_v26  ;;  %v977_v15 = vadd.s32 %v2032_v22, %v2029_v16 }
  0xe6   : > { %v904_v34 = vsel %vm819_vm9, %v903_v11, %v2001_v27  ;;  %vm909_vm1 = vweird.f32 %v1473_v38  ;;  %vm923_vm2 = vcmp.lt.s32.totalorder %v1475_v39, 0  ;;  %vm922_vm3 = vcmp.le.f32.partialorder %v921_v51, 0.7853982 }
  0xe7   : > { %v1267_v48 = vpop.eup %1266  ;;  %v896_v0 = vor.u32 4788187, %v895_v31  ;;  %v899_v24 = vcvt.s32.f32 %v892_v32  ;;  %v982_v40 = vadd.s32 536870912, %v981_v46  ;;  %v906_v13 = vsel %vm818_vm12, 0, %v904_v34 }
  0xe8   : > { %v1269_v43 = vpop.eup %1268  ;;  %v813_v3 = vxor.u32 2147483648, %v1267_v48  ;;  %v910_v44 = vadd.s32 3, %v906_v13 }
  0xe9   : > { %v810_v33 = vxor.u32 2147483648, %v1269_v43  ;;  %v897_v49 = vand.u32 2147483647, %v896_v0  ;;  %v983_v53 = vshrl.u32 %v982_v40, 30 }
  0xea   : > { %v814_v17 = vsel %vm812_vm7, %v813_v3, %v1269_v43  ;;  %v911_v10 = vand.u32 3, %v910_v44  ;;  %vm1013_vm7 = vweird.f32 %v1475_v39 }
  0xeb   : > { %v811_v47 = vsel %vm809_vm10, %v1267_v48, %v810_v33  ;;  %v900_v35 = vmul.f32 %v899_v24, %v897_v49  ;;  %v984_v36 = vshll.u32 %v983_v53, 30  ;;  %v1007_v45 = vsub.s32 4, %v983_v53 }
  0xec   : > { %v815_v62 = vsel %vm808_vm8, %v811_v47, %v814_v17  ;;  %vm916_vm14 = vcmp.eq.s32.totalorder %v911_v10, 2  ;;  %vm913_vm15 = vcmp.eq.s32.totalorder %v911_v10, 0  ;;  %vm912_vm0 = vcmp.lt.s32.totalorder %v911_v10, 2 }
  0xed   : > { %v816_v9 = vsel %vm805_vm11, nan, %v815_v62  ;;  %v901_v42 = vxor.u32 2147483648, %v900_v35  ;;  %v985_v37 = vsub.s32 %v981_v46, %v984_v36 }
  0xee   : > { %1030 = vst [vmem:[%s1778_s5 + $0x28] sm:$0xff] %v816_v9 }
  0xef   : > { %v902_v54 = vsel %vm819_vm9, %v901_v42, %v900_v35  ;;  %v987_v7 = vsub.s32 0, %v985_v37 }
  0xf0   : > { %v905_v8 = vsel %vm818_vm12, %v1473_v38, %v902_v54  ;;  %v1008_v38 = vsel %vm923_vm2, %v1007_v45, %v983_v53 }
  0xf1   : > { %1270 = vcosq.f32 %v905_v8  ;;  %v1147_v50 = vmin.u32 %v987_v7, %v985_v37  ;;  %v1010_v41 = vsel %vm922_vm3, 0, %v1008_v38 }
  0xf2   : > { %1272 = vsinq.f32 %v905_v8  ;;  %v1014_v29 = vadd.s32 3, %v1010_v41 }
  0xf3   : > { %v989_v1 = vclz %v1147_v50 }
  0xf4   : > { %v1015_v26 = vand.u32 3, %v1014_v29 }
  0xf5   : > { %v1148_v55 = vadd.s32 4294967294, %v989_v1 }
  0xf6   : > { %vm1020_vm4 = vcmp.eq.s32.totalorder %v1015_v26, 2  ;;  %vm1017_vm5 = vcmp.eq.s32.totalorder %v1015_v26, 0  ;;  %vm1016_vm6 = vcmp.lt.s32.totalorder %v1015_v26, 2 }
  0xf7   : > { %vm1149_vm13 = vcmp.lt.s32.totalorder %v1148_v55, 0 }
  0xf8   : > { %v992_v23 = vsel %vm1149_vm13, 0, %v1148_v55 }
  0xf9   : > { %v993_v30 = vsub.s32 32, %v992_v23  ;;  %v994_v59 = vshll.u32 %v985_v37, %v992_v23  ;;  %v997_v56 = vsub.s32 4294967266, %v992_v23 }
  0xfb   : > { %v995_v57 = vshrl.u32 %v977_v15, %v993_v30  ;;  %v998_v27 = vadd.s32 127, %v997_v56 }
  0xfd   : > { %v996_v60 = vor.u32 %v995_v57, %v994_v59  ;;  %v999_v61 = vshll.u32 %v998_v27, 23 }
  0xfe   : > { %v1271_v63 = vpop.eup %1270 }
  0xff   : > { %v1273_v52 = vpop.eup %1272  ;;  %v917_v4 = vxor.u32 2147483648, %v1271_v63  ;;  %v1000_v19 = vor.u32 4788187, %v999_v61  ;;  %v1003_v6 = vcvt.s32.f32 %v996_v60 }
 0x100   : > { %v914_v12 = vxor.u32 2147483648, %v1273_v52 }
 0x101   : > { %v918_v5 = vsel %vm916_vm14, %v917_v4, %v1273_v52  ;;  %v1001_v21 = vand.u32 2147483647, %v1000_v19 }
 0x102   : > { %v915_v16 = vsel %vm913_vm15, %v1271_v63, %v914_v12 }
 0x103   : > { %v919_v14 = vsel %vm912_vm0, %v915_v16, %v918_v5  ;;  %v1004_v2 = vmul.f32 %v1003_v6, %v1001_v21 }
 0x104   : > { %v920_v22 = vsel %vm909_vm1, nan, %v919_v14 }
 0x105   : > { %1031 = vst [vmem:[%s1778_s5 + $0x30] sm:$0xff] %v920_v22  ;;  %v1005_v20 = vxor.u32 2147483648, %v1004_v2 }
 0x107   : > { %v1006_v25 = vsel %vm923_vm2, %v1005_v20, %v1004_v2 }
 0x108   : > { %v1009_v58 = vsel %vm922_vm3, %v1475_v39, %v1006_v25 }
 0x109   : > { %1274 = vcosq.f32 %v1009_v58 }
 0x10a   : > { %1276 = vsinq.f32 %v1009_v58 }
 0x116   : > { %v1275_v18 = vpop.eup %1274 }
 0x117   : > { %v1277_v48 = vpop.eup %1276  ;;  %v1021_v32 = vxor.u32 2147483648, %v1275_v18 }
 0x118   : > { %v1018_v51 = vxor.u32 2147483648, %v1277_v48 }
 0x119   : > { %v1022_v31 = vsel %vm1020_vm4, %v1021_v32, %v1277_v48 }
 0x11a   : > { %v1019_v43 = vsel %vm1017_vm5, %v1275_v18, %v1018_v51 }
 0x11b   : > { %v1023_v3 = vsel %vm1016_vm6, %v1019_v43, %v1022_v31 }
 0x11c   : > { %v1024_v28 = vsel %vm1013_vm7, nan, %v1023_v3 }
 0x11d   : > { %1032 = vst [vmem:[%s1778_s5 + $0x38] sm:$0xff] %v1024_v28 }
 0x11e   : > { %1317 = shalt.err (!%p1314_p1)
}
 0x11f   : > { %s1318_s24 = scalar_lea.hbm %s2059_s16, 1024  ;;  %s1322_s27 = scalar_lea.hbm %s2108_s2, 2048 }
 0x120   : > { %p1319_p2 = scmp.ne.s32.totalorder %s2059_s16, %s1318_s24  ;;  %p1323_p7 = scmp.lt.s32.totalorder %s2059_s16, %s2108_s2 }
 0x121   : > { %p1324_p8 = scmp.lt.s32.totalorder %s1322_s27, %s1318_s24 }
 0x122   : > { %p1320_p3 = pnand %p1319_p2, %p1433_p5 }
 0x123   : > { %p1325_p9 = por %p1324_p8, %p1323_p7 }
 0x124   : > { %p1321_p4 = pneg %p1320_p3 }
 0x126   : > { %p1326_p10 = pnand %p1325_p9, %p1321_p4 }
 0x128   : > { %1329 = shalt.err (!%p1326_p10)
}
 0x129   : > { %s1378_s30 = smov 128   ;;  %s1379_s3 = smov 8  }
 0x12a   : > { %1192 = dma.vmem_to_hbm [thread:$0]  (%p1433_p5), %s2061_s7, 1024, %s2059_s16, %s2066_s13, %s1378_s30, %s1378_s30, %s1379_s3  }
 0x12b PF: > { %p1204_p11 = scmp.ge.s32.totalorder %s1368_s12, 2  ;;  %s1062_s4 = sand.u32 1, %s1356_s9  }
 0x12c   : > { %s1063_s5 = scalar_lea.sflag [#allocation4], %s1062_s4 }
 0x12d   : > { %p1199_p12 = pnand %p1204_p11, %p1437_p6 }
 0x12f   : > { %p1200_p13 = pneg %p1199_p12 }
 0x131   : > { %1351 = dma.done.wait (%p1200_p13), %s1063_s5, 1024  }
 0x132   : > { %1353 = vsyncadd (%p1200_p13), %s1063_s5, 4294966272  ;;  %p13_p0 = scmp.ge.s32.totalorder %s1420_s15, 4   ;;  %s2124_s9 = smov %s1360_s10 }
 0x133   : > { %s2125_s10 = smov %s1364_s11  ;;  %s2126_s11 = smov %s1431_s18 }
 0x134   : > { %s2127_s12 = smov %s1420_s15  ;;  %15 = sbr.rel (!%p13_p0) target bundleno = 4 (0x4), region = 65 }
 0x139   :  { %1068 = vsyncpa [#allocation3], 1 }
 0x13a   :  { %1070 = vsyncpa [#allocation3 + $0x1], 1 }
 0x13b   :  { %1071 = vsyncpa [#allocation4], 1 }
 0x13c   :  { %1073 = vsyncpa [#allocation4 + $0x1], 1 }

</bundles_post_ra>
